<compile_context>
chip_gen: v6e
topology: v6e:2x2x1
jax: 0.10.0
libtpu: 0.0.40
codegen_flags: <defaults>
</compile_context>

<pallas_src>
import math
from functools import partial

import jax
import jax.numpy as jnp
from jax.experimental import pallas as pl
from jax.experimental.pallas import tpu as pltpu

_HALF_LOG_2PI = 0.5 * math.log(2.0 * math.pi)
_FIXED_VAR = 0.02 ** 2  # decoder variance floor used by the module when switch == 0


def _choose_tile_rows(n, max_rows=512):
    """Largest row tile <= max_rows that evenly divides n (multiple of 8 if gridded)."""
    if n <= max_rows:
        return n
    tb = max_rows - (max_rows % 8)
    while tb >= 8:
        if n % tb == 0:
            return tb
        tb -= 8
    return n  # fall back to a single full-array block


def _make_vae_kernel(*, epsilon, switch, D, L, tile_rows):
    """Builds the fused forward kernel; `switch` is specialized at trace time."""
    switch = float(switch)
    switch_is_zero = (switch == 0.0)

    # When switch == 0, x_var == 0.02**2 everywhere -> decoder scale and its
    # log-normalizer are compile-time constants (no divide, no log in-kernel).
    const_p_scale = math.sqrt(_FIXED_VAR) + epsilon
    const_inv_p = 1.0 / const_p_scale
    const_logpx_bias = -float(D) * (math.log(const_p_scale) + _HALF_LOG_2PI)

    def kernel(xa_ref, eps_ref, enc_ref, dec_ref, big_ref, stats_ref):
        x_aug = xa_ref[...]                 # (TB, D+1), last column == 1 (bias fold)
        eps = eps_ref[...]                  # (TB, L)
        x = x_aug[:, 0:D]                   # (TB, D)

        # ---- encoder: one MXU matmul, bias folded in via the ones column -------
        h = jnp.dot(x_aug, enc_ref[...], preferred_element_type=jnp.float32)  # (TB, 2L)
        z_mu = h[:, 0:L]
        z_var = jax.nn.softplus(h[:, L:2 * L])
        q_scale = jnp.sqrt(z_var) + epsilon
        z = z_mu + q_scale * eps            # reparameterized sample

        # ---- decoder: K == L is tiny -> VPU broadcast-FMA instead of MXU -------
        dec = dec_ref[...]                  # (L+1, Dout); last row = bias
        h_dec = dec[L:L + 1, :]             # bias row, broadcasts over TB
        for k in range(L):                  # static unroll (L is small)
            h_dec = h_dec + z[:, k:k + 1] * dec[k:k + 1, :]

        if switch_is_zero:
            x_mu = h_dec                    # (TB, D)
            r = (x - x_mu) * const_inv_p
            logpx_sum = jnp.sum(-0.5 * r * r) + float(tile_rows) * const_logpx_bias
        else:
            x_mu = h_dec[:, 0:D]
            x_var = (switch * jax.nn.softplus(h_dec[:, D:2 * D])
                     + (1.0 - switch) * _FIXED_VAR)
            p_scale = jnp.sqrt(x_var) + epsilon
            r = (x - x_mu) * pl.reciprocal(p_scale, approx=True)   # EUP, not VPU divide
            logpx_sum = (jnp.sum(-0.5 * r * r - jnp.log(p_scale))
                         - float(tile_rows * D) * _HALF_LOG_2PI)

        # KL(q || N(0, I)); exploits (z - z_mu)/q_scale == eps exactly
        kl_sum = jnp.sum(0.5 * (z * z - eps * eps) - jnp.log(q_scale))

        # ---- single merged (TB, Dout+3L) output -> one writeback DMA -----------
        big_ref[:, 0:D] = x_mu
        off = D
        if not switch_is_zero:
            big_ref[:, D:2 * D] = x_var
            off = 2 * D
        big_ref[:, off:off + L] = z
        big_ref[:, off + L:off + 2 * L] = z_mu
        big_ref[:, off + 2 * L:off + 3 * L] = z_var

        # ---- per-tile partial sums, scalar stores to SMEM -----------------------
        stats_ref[0, 0] = logpx_sum
        stats_ref[0, 1] = kl_sum

    return kernel


def pack_vae_params(params, *, switch=0.0):
    """One-time parameter packing (keep OUT of the per-call hot path)."""
    f32 = jnp.float32
    enc_pack = jnp.concatenate(
        [jnp.concatenate([params["w_enc_mu"], params["w_enc_var"]], axis=1),
         jnp.concatenate([params["b_enc_mu"], params["b_enc_var"]], axis=1)],
        axis=0).astype(f32)                                            # (D+1, 2L)
    if float(switch) == 0.0:
        dec_pack = jnp.concatenate(
            [params["w_dec_mu"], params["b_dec_mu"]], axis=0).astype(f32)   # (L+1, D)
    else:
        dec_pack = jnp.concatenate(
            [jnp.concatenate([params["w_dec_mu"], params["w_dec_var"]], axis=1),
             jnp.concatenate([params["b_dec_mu"], params["b_dec_var"]], axis=1)],
            axis=0).astype(f32)                                        # (L+1, 2D)
    return enc_pack, dec_pack


@partial(jax.jit, static_argnames=("beta", "epsilon", "switch"))
def vae_forward_pallas(x, noise, enc_pack, dec_pack, *,
                       beta=1.0, epsilon=1e-5, switch=0.0):
    """Batched VAE forward in a single gridded Pallas call.

    x: (N, D) float32, noise: (N, L) float32 (the rsample standard-normal draw).
    Returns (elbo_mean, logpx_mean, kl_mean, x_mu, x_var, z, z_mu, z_var).
    """
    f32 = jnp.float32
    N, D = x.shape
    L = noise.shape[1]
    switch = float(switch)

    tb = _choose_tile_rows(N)
    grid_n = N // tb
    assert grid_n * tb == N

    # Bias fold for the encoder matmul: x_aug = [x | 1].
    x_aug = jnp.concatenate([x.astype(f32), jnp.ones((N, 1), f32)], axis=1)
    noise = noise.astype(f32)

    d_out = D if switch == 0.0 else 2 * D
    big_cols = d_out + 3 * L

    kernel = _make_vae_kernel(epsilon=float(epsilon), switch=switch,
                              D=D, L=L, tile_rows=tb)
    vmem = pltpu.MemorySpace.VMEM
    smem = pltpu.MemorySpace.SMEM

    big, stats = pl.pallas_call(
        kernel,
        grid=(grid_n,),
        in_specs=[
            pl.BlockSpec((tb, D + 1), lambda i: (i, 0), memory_space=vmem),
            pl.BlockSpec((tb, L), lambda i: (i, 0), memory_space=vmem),
            pl.BlockSpec((D + 1, 2 * L), lambda i: (0, 0), memory_space=vmem),
            pl.BlockSpec(dec_pack.shape, lambda i: (0, 0), memory_space=vmem),
        ],
        out_specs=(
            pl.BlockSpec((tb, big_cols), lambda i: (i, 0), memory_space=vmem),
            pl.BlockSpec((1, 2), lambda i: (i, 0), memory_space=smem),
        ),
        out_shape=(
            jax.ShapeDtypeStruct((N, big_cols), f32),   # [x_mu | (x_var) | z | z_mu | z_var]
            jax.ShapeDtypeStruct((grid_n, 2), f32),     # per-tile [sum log_px, sum kl]
        ),
        compiler_params=pltpu.CompilerParams(
            dimension_semantics=("parallel",)),          # shard batch across TCs (v7x)
    )(x_aug, noise, enc_pack, dec_pack)

    # Means derived from per-tile partial sums (mean is linear).
    logpx_mean = jnp.sum(stats[:, 0]) / N
    kl_mean = jnp.sum(stats[:, 1]) / N
    elbo_mean = logpx_mean - beta * kl_mean

    x_mu = big[:, 0:D]
    if switch == 0.0:
        # switch == 0: x_var == 0.02**2 everywhere (matches 0*dec_var(z) + 1*0.02**2).
        x_var = jnp.full((N, D), _FIXED_VAR, dtype=f32)
        off = D
    else:
        x_var = big[:, D:2 * D]
        off = 2 * D
    z = big[:, off:off + L]
    z_mu = big[:, off + L:off + 2 * L]
    z_var = big[:, off + 2 * L:off + 3 * L]
    return elbo_mean, logpx_mean, kl_mean, x_mu, x_var, z, z_mu, z_var


def vae_forward_ref(x, noise, p, *, beta=1.0, epsilon=1e-5, switch=0.0):
    """Pure-JAX reference mirroring the PyTorch forward semantics."""
    z_mu = x @ p["w_enc_mu"] + p["b_enc_mu"]
    z_var = jax.nn.softplus(x @ p["w_enc_var"] + p["b_enc_var"])
    qs = jnp.sqrt(z_var) + epsilon
    z = z_mu + qs * noise
    x_mu = z @ p["w_dec_mu"] + p["b_dec_mu"]
    x_var = switch * jax.nn.softplus(z @ p["w_dec_var"] + p["b_dec_var"]) \
        + (1.0 - switch) * (0.02 ** 2)
    ps = jnp.sqrt(x_var) + epsilon
    log_px = jnp.sum(-0.5 * ((x - x_mu) / ps) ** 2 - jnp.log(ps) - _HALF_LOG_2PI, axis=-1)
    log_qz = jnp.sum(-0.5 * ((z - z_mu) / qs) ** 2 - jnp.log(qs) - _HALF_LOG_2PI, axis=-1)
    log_pz = jnp.sum(-0.5 * z * z - _HALF_LOG_2PI, axis=-1)
    kl = log_qz - log_pz
    elbo = log_px - beta * kl
    return elbo.mean(), log_px.mean(), kl.mean(), x_mu, x_var, z, z_mu, z_var


if __name__ == "__main__":
    # N = 16 samples batched through one gridded call (grid of 2 row-tiles of 8),
    # D = 32 flat feature dim, L = 2 latent_size (module default).
    N, D, L = 16, 32, 2

    key = jax.random.PRNGKey(0)
    kx, kn, k1, k2, k3, k4, k5, k6, k7, k8 = jax.random.split(key, 10)

    x = jax.random.normal(kx, (N, D), dtype=jnp.float32)
    noise = jax.random.normal(kn, (N, L), dtype=jnp.float32)  # rsample draw

    params = {
        "w_enc_mu":  0.1 * jax.random.normal(k1, (D, L), dtype=jnp.float32),
        "b_enc_mu":  0.1 * jax.random.normal(k2, (1, L), dtype=jnp.float32),
        "w_enc_var": 0.1 * jax.random.normal(k3, (D, L), dtype=jnp.float32),
        "b_enc_var": 0.1 * jax.random.normal(k4, (1, L), dtype=jnp.float32),
        "w_dec_mu":  0.1 * jax.random.normal(k5, (L, D), dtype=jnp.float32),
        "b_dec_mu":  0.1 * jax.random.normal(k6, (1, D), dtype=jnp.float32),
        "w_dec_var": 0.1 * jax.random.normal(k7, (L, D), dtype=jnp.float32),
        "b_dec_var": 0.1 * jax.random.normal(k8, (1, D), dtype=jnp.float32),
    }

    # One-time packing (outside the hot path).
    enc_pack, dec_pack = pack_vae_params(params, switch=0.0)

    outs = vae_forward_pallas(x, noise, enc_pack, dec_pack,
                              beta=1.0, epsilon=1e-5, switch=0.0)
    outs = jax.block_until_ready(outs)

    refs = vae_forward_ref(x, noise, params, beta=1.0, epsilon=1e-5, switch=0.0)
    names = ["elbo", "log_px", "kl", "x_mu", "x_var", "z", "z_mu", "z_var"]
    for name, got, want in zip(names, outs, refs):
        got = jnp.asarray(got).reshape(jnp.asarray(want).shape)
        assert jnp.allclose(got, want, rtol=2e-4, atol=5e-4), f"mismatch in {name}"

    print("KERNEL_OK")
</pallas_src>

<mosaic_0001>
module attributes {stable_mosaic.version = 11 : i64} {
  func.func @kernel(%arg0: i32, %arg1: memref<16x33xf32, #tpu.memory_space<vmem>>, %arg2: memref<16x2xf32, #tpu.memory_space<vmem>>, %arg3: memref<33x4xf32, #tpu.memory_space<vmem>>, %arg4: memref<3x32xf32, #tpu.memory_space<vmem>>, %arg5: memref<16x38xf32, #tpu.memory_space<vmem>>, %arg6: memref<1x2xf32, #tpu.memory_space<smem>>) attributes {dimension_semantics = [#tpu.dimension_semantics<parallel>], iteration_bounds = array<i64: 1>, scalar_prefetch = 0 : i64, scratch_operands = 0 : i64, tpu.core_type = #tpu.core_type<tc>, window_params = [{transform_indices = @transform_0, window_bounds = array<i64: 16, 33>}, {transform_indices = @transform_1, window_bounds = array<i64: 16, 2>}, {pipeline_mode = #tpu.pipeline_mode<synchronous>, transform_indices = @transform_2, window_bounds = array<i64: 33, 4>}, {pipeline_mode = #tpu.pipeline_mode<synchronous>, transform_indices = @transform_3, window_bounds = array<i64: 3, 32>}, {transform_indices = @transform_4, window_bounds = array<i64: 16, 38>}, {transform_indices = @transform_5, window_bounds = array<i64: 1, 2>}]} {
    %c0 = arith.constant 0 : index
    %c0_0 = arith.constant 0 : index
    %0 = vector.load %arg1[%c0, %c0_0] : memref<16x33xf32, #tpu.memory_space<vmem>>, vector<16x33xf32>
    %c0_1 = arith.constant 0 : index
    %c0_2 = arith.constant 0 : index
    %1 = vector.load %arg2[%c0_1, %c0_2] : memref<16x2xf32, #tpu.memory_space<vmem>>, vector<16x2xf32>
    %2 = vector.extract_strided_slice %0 {offsets = [0, 0], sizes = [16, 32], strides = [1, 1]} : vector<16x33xf32> to vector<16x32xf32>
    %c0_3 = arith.constant 0 : index
    %c0_4 = arith.constant 0 : index
    %3 = vector.load %arg3[%c0_3, %c0_4] : memref<33x4xf32, #tpu.memory_space<vmem>>, vector<33x4xf32>
    %cst = arith.constant dense<0.000000e+00> : vector<16x4xf32>
    %4 = tpu.matmul %0, %3, %cst {dimension_numbers = #tpu.dot_dimension_numbers<[1], [0], [0], [1], [0, 0, 1, 1], [], []>} : vector<16x33xf32>, vector<33x4xf32>, vector<16x4xf32> -> vector<16x4xf32>
    %5 = vector.extract_strided_slice %4 {offsets = [0, 0], sizes = [16, 2], strides = [1, 1]} : vector<16x4xf32> to vector<16x2xf32>
    %6 = vector.extract_strided_slice %4 {offsets = [0, 2], sizes = [16, 2], strides = [1, 1]} : vector<16x4xf32> to vector<16x2xf32>
    %cst_5 = arith.constant 0.000000e+00 : f32
    %7 = vector.broadcast %cst_5 : f32 to vector<16x2xf32>
    %8 = arith.maximumf %6, %7 : vector<16x2xf32>
    %9 = vector.broadcast %cst_5 : f32 to vector<16x2xf32>
    %10 = arith.subf %6, %9 : vector<16x2xf32>
    %11 = arith.cmpf one, %10, %10 : vector<16x2xf32>
    %12 = vector.broadcast %cst_5 : f32 to vector<16x2xf32>
    %13 = arith.addf %6, %12 : vector<16x2xf32>
    %14 = math.absf %10 : vector<16x2xf32>
    %cst_6 = arith.constant 0.000000e+00 : f32
    %15 = vector.broadcast %cst_6 : f32 to vector<16x2xf32>
    %16 = arith.subf %15, %14 : vector<16x2xf32>
    %17 = math.exp %16 : vector<16x2xf32>
    %18 = math.log1p %17 : vector<16x2xf32>
    %19 = arith.addf %8, %18 : vector<16x2xf32>
    %20 = arith.select %11, %13, %19 : vector<16x2xi1>, vector<16x2xf32>
    %21 = math.sqrt %20 : vector<16x2xf32>
    %cst_7 = arith.constant 9.99999974E-6 : f32
    %22 = vector.broadcast %cst_7 : f32 to vector<16x2xf32>
    %23 = arith.addf %21, %22 : vector<16x2xf32>
    %24 = arith.mulf %23, %1 : vector<16x2xf32>
    %25 = arith.addf %5, %24 : vector<16x2xf32>
    %c0_8 = arith.constant 0 : index
    %c0_9 = arith.constant 0 : index
    %26 = vector.load %arg4[%c0_8, %c0_9] : memref<3x32xf32, #tpu.memory_space<vmem>>, vector<3x32xf32>
    %27 = vector.extract_strided_slice %26 {offsets = [2, 0], sizes = [1, 32], strides = [1, 1]} : vector<3x32xf32> to vector<1x32xf32>
    %28 = vector.extract_strided_slice %25 {offsets = [0, 0], sizes = [16, 1], strides = [1, 1]} : vector<16x2xf32> to vector<16x1xf32>
    %29 = vector.extract_strided_slice %26 {offsets = [0, 0], sizes = [1, 32], strides = [1, 1]} : vector<3x32xf32> to vector<1x32xf32>
    %30 = vector.broadcast %28 : vector<16x1xf32> to vector<16x32xf32>
    %31 = vector.broadcast %29 : vector<1x32xf32> to vector<16x32xf32>
    %32 = arith.mulf %30, %31 : vector<16x32xf32>
    %33 = vector.broadcast %27 : vector<1x32xf32> to vector<16x32xf32>
    %34 = arith.addf %33, %32 : vector<16x32xf32>
    %35 = vector.extract_strided_slice %25 {offsets = [0, 1], sizes = [16, 1], strides = [1, 1]} : vector<16x2xf32> to vector<16x1xf32>
    %36 = vector.extract_strided_slice %26 {offsets = [1, 0], sizes = [1, 32], strides = [1, 1]} : vector<3x32xf32> to vector<1x32xf32>
    %37 = vector.broadcast %35 : vector<16x1xf32> to vector<16x32xf32>
    %38 = vector.broadcast %36 : vector<1x32xf32> to vector<16x32xf32>
    %39 = arith.mulf %37, %38 : vector<16x32xf32>
    %40 = arith.addf %34, %39 : vector<16x32xf32>
    %41 = arith.subf %2, %40 : vector<16x32xf32>
    %cst_10 = arith.constant 49.9750137 : f32
    %42 = vector.broadcast %cst_10 : f32 to vector<16x32xf32>
    %43 = arith.mulf %41, %42 : vector<16x32xf32>
    %cst_11 = arith.constant -5.000000e-01 : f32
    %44 = vector.broadcast %cst_11 : f32 to vector<16x32xf32>
    %45 = arith.mulf %44, %43 : vector<16x32xf32>
    %46 = arith.mulf %45, %43 : vector<16x32xf32>
    %47 = vector.shape_cast %46 : vector<16x32xf32> to vector<1x16x32xf32>
    %cst_12 = arith.constant dense<0.000000e+00> : vector<1xf32>
    %48 = vector.multi_reduction <add>, %47, %cst_12 [1, 2] : vector<1x16x32xf32> to vector<1xf32>
    %49 = vector.shape_cast %48 : vector<1xf32> to vector<1x1x1xf32>
    %50 = vector.extract %49[0, 0, 0] : f32 from vector<1x1x1xf32>
    %cst_13 = arith.constant 1532.20337 : f32
    %51 = arith.addf %50, %cst_13 : f32
    %52 = arith.mulf %25, %25 : vector<16x2xf32>
    %53 = arith.mulf %1, %1 : vector<16x2xf32>
    %54 = arith.subf %52, %53 : vector<16x2xf32>
    %cst_14 = arith.constant 5.000000e-01 : f32
    %55 = vector.broadcast %cst_14 : f32 to vector<16x2xf32>
    %56 = arith.mulf %55, %54 : vector<16x2xf32>
    %57 = math.log %23 : vector<16x2xf32>
    %58 = arith.subf %56, %57 : vector<16x2xf32>
    %59 = vector.shape_cast %58 : vector<16x2xf32> to vector<1x16x2xf32>
    %cst_15 = arith.constant dense<0.000000e+00> : vector<1xf32>
    %60 = vector.multi_reduction <add>, %59, %cst_15 [1, 2] : vector<1x16x2xf32> to vector<1xf32>
    %61 = vector.shape_cast %60 : vector<1xf32> to vector<1x1x1xf32>
    %62 = vector.extract %61[0, 0, 0] : f32 from vector<1x1x1xf32>
    %c0_16 = arith.constant 0 : index
    %c0_17 = arith.constant 0 : index
    %63 = vector.load %arg5[%c0_16, %c0_17] : memref<16x38xf32, #tpu.memory_space<vmem>>, vector<16x32xf32>
    tpu.vector_store %arg5[%c0_16, %c0_17], %40 {strides = array<i32>} : memref<16x38xf32, #tpu.memory_space<vmem>>, vector<16x32xf32>,
    %c0_18 = arith.constant 0 : index
    %c32 = arith.constant 32 : index
    %64 = vector.load %arg5[%c0_18, %c32] : memref<16x38xf32, #tpu.memory_space<vmem>>, vector<16x2xf32>
    tpu.vector_store %arg5[%c0_18, %c32], %25 {strides = array<i32>} : memref<16x38xf32, #tpu.memory_space<vmem>>, vector<16x2xf32>,
    %c0_19 = arith.constant 0 : index
    %c34 = arith.constant 34 : index
    %65 = vector.load %arg5[%c0_19, %c34] : memref<16x38xf32, #tpu.memory_space<vmem>>, vector<16x2xf32>
    tpu.vector_store %arg5[%c0_19, %c34], %5 {strides = array<i32>} : memref<16x38xf32, #tpu.memory_space<vmem>>, vector<16x2xf32>,
    %c0_20 = arith.constant 0 : index
    %c36 = arith.constant 36 : index
    %66 = vector.load %arg5[%c0_20, %c36] : memref<16x38xf32, #tpu.memory_space<vmem>>, vector<16x2xf32>
    tpu.vector_store %arg5[%c0_20, %c36], %20 {strides = array<i32>} : memref<16x38xf32, #tpu.memory_space<vmem>>, vector<16x2xf32>,
    %c0_21 = arith.constant 0 : index
    %c0_22 = arith.constant 0 : index
    %67 = memref.load %arg6[%c0_21, %c0_22] : memref<1x2xf32, #tpu.memory_space<smem>>
    memref.store %51, %arg6[%c0_21, %c0_22] : memref<1x2xf32, #tpu.memory_space<smem>>
    %c0_23 = arith.constant 0 : index
    %c1 = arith.constant 1 : index
    %68 = memref.load %arg6[%c0_23, %c1] : memref<1x2xf32, #tpu.memory_space<smem>>
    memref.store %62, %arg6[%c0_23, %c1] : memref<1x2xf32, #tpu.memory_space<smem>>
    return
  }
  func.func @transform_0(%arg0: i32) -> (i32, i32) {
    %c0_i32 = arith.constant 0 : i32
    %c0_i32_0 = arith.constant 0 : i32
    return %arg0, %c0_i32 : i32, i32
  }
  func.func @transform_1(%arg0: i32) -> (i32, i32) {
    %c0_i32 = arith.constant 0 : i32
    %c0_i32_0 = arith.constant 0 : i32
    return %arg0, %c0_i32 : i32, i32
  }
  func.func @transform_2(%arg0: i32) -> (i32, i32) {
    %c0_i32 = arith.constant 0 : i32
    %c0_i32_0 = arith.constant 0 : i32
    %c0_i32_1 = arith.constant 0 : i32
    return %c0_i32, %c0_i32_0 : i32, i32
  }
  func.func @transform_3(%arg0: i32) -> (i32, i32) {
    %c0_i32 = arith.constant 0 : i32
    %c0_i32_0 = arith.constant 0 : i32
    %c0_i32_1 = arith.constant 0 : i32
    return %c0_i32, %c0_i32_0 : i32, i32
  }
  func.func @transform_4(%arg0: i32) -> (i32, i32) {
    %c0_i32 = arith.constant 0 : i32
    %c0_i32_0 = arith.constant 0 : i32
    return %arg0, %c0_i32 : i32, i32
  }
  func.func @transform_5(%arg0: i32) -> (i32, i32) {
    %c0_i32 = arith.constant 0 : i32
    %c0_i32_0 = arith.constant 0 : i32
    return %arg0, %c0_i32 : i32, i32
  }
}

</mosaic_0001>

<bundles_post_ra>
// kernel: vae_forward_pallas.1
= control target key start
LH: loop header
LB: loop body
LE: loop exit
PB: predicated region body
PF: predicated region fallthrough
CT: control target
= control target key end

     0   :  { %vm36_vm0 = vcmask 1040384   ;;  %vm29_vm1 = vcmask 269312   ;;  %s407_s28 = smov 2   ;;  %s575_s0 = inlined_call_operand.vmem [shape: f32[16,33], index: 0, kind: input, shape index: {}]   ;;  %s576_s1 = inlined_call_operand.vmem [shape: f32[16,2], index: 1, kind: input, shape index: {}]   ;;  %s577_s2 = inlined_call_operand.vmem [shape: f32[33,4], index: 2, kind: input, shape index: {}]   ;;  %s578_s3 = inlined_call_operand.vmem [shape: f32[3,32], index: 3, kind: input, shape index: {}]   ;;  %s579_s4 = inlined_call_operand.vmem [shape: f32[16,38], index: 4, kind: output, shape index: {0}]   ;;  %s580_s5 = inlined_call_operand.vmem [shape: f32[1,2], index: 5, kind: output, shape index: {1}]  }
   0x1   :  { %v28_v0 = vld [vmem:[%s577_s2 + $0x20] sm:$0x1]  ;;  %v27_v1 = vld [vmem:[%s577_s2 + $0x18] sm:$0xff]  ;;  %v26_v3 = vld [vmem:[%s577_s2 + $0x10] sm:$0xff] }
   0x2   :  { %349 = vmatprep.subr.msk.mxu0 %vm36_vm0, %v28_v0  ;;  %v453_v2 = vld [vmem:[%s575_s0] sm:$0xff] }
   0x3   :  { %350 = vmatpush3.msk.msra.mxu0 %vm36_vm0, %v28_v0  ;;  %359 = vmatprep.mubr.msk.f32.mxu0 %vm29_vm1, %v453_v2  ;;  %v463_v4 = vld [vmem:[%s576_s1] sm:$0xff] }
   0x4   :  { %351 = vmatprep.subr.mxu0 %v27_v1  ;;  %169 = vrot.lane.b32.xlu0 %v463_v4, %s407_s28 }
   0x5   :  { %11 = vsyncpa [#allocation3], 0  ;;  %352 = vmatpush3.msra.mxu0 %v27_v1  ;;  %v25_v5 = vld [vmem:[%s577_s2 + $0x8] sm:$0xff]  ;;  %v24_v7 = vld [vmem:[%s577_s2] sm:$0xff]  ;;  %v408_v41 = vmov 0   ;;  %v410_v62 = vmov 1  }
   0x6   :  { %v472_v6 = vld [vmem:[%s576_s1 + $0x8] sm:$0xff]  ;;  %353 = vmatprep.subr.mxu0 %v26_v3  ;;  %374 = vset.pattern.permute.xlu0 %v408_v41  ;;  %vm234_vm10 = vcmask 261120   ;;  %vm270_vm11 = vcmask 15360   ;;  %s411_s15 = smov 32   ;;  %s412_s16 = smov 34   ;;  %vm291_vm12 = vcmask 277760  }
   0x7   :  { %354 = vmatpush3.msra.mxu0 %v26_v3  ;;  %v481_v8 = vld [vmem:[%s575_s0 + $0x8] sm:$0xff]  ;;  %373 = vset.pattern.permute.xlu1 %v408_v41  ;;  %s409_s0 = smov 126   ;;  %vm302_vm13 = vcmask 294160   ;;  %vm313_vm14 = vcmask 310560   ;;  %s328_s6 = sshll.u32 %s580_s5, 4  ;;  %s329_s6 = int_to_ptr.vmem [resolvable:$true] %s328_s6 }
   0x8   :  { %355 = vmatprep.subr.mxu0 %v25_v5  ;;  %171 = vrot.lane.b32.xlu0 %v472_v6, %s407_s28  ;;  %s393_s10 = scalar_lea.vmem %s329_s6, 16  ;;  %p398_p1 = scmp.lt.s32.totalorder %s329_s6, %s329_s6 }
   0x9   :  { %356 = vmatpush3.msra.mxu0 %v25_v5  ;;  %v198_v5 = vlaneseq  ;;  %p394_p0 = scmp.ne.s32.totalorder %s329_s6, %s393_s10  ;;  %p399_p2 = scmp.lt.s32.totalorder %s393_s10, %s393_s10 }
   0xa   :  { %357 = vmatprep.subr.mxu0 %v24_v7 }
   0xb   :  { %358 = vmatpush3.msra.mxu0 %v24_v7  ;;  %v199_v7 = vshrl.u32 %v198_v5, 7  ;;  %p400_p3 = por %p399_p2, %p398_p1 }
   0xc   :  { %360 = vmatmul.mubr.msk.f32.vlgmr.msra.gmra.mxu0 %vm29_vm1, %v481_v8 }
   0xd   :  { %p401_p4 = pnand %p400_p3, %p394_p0 }
  0x76   :  { %v170_v47 = vpop.permute.xlu0 %169 }
  0x7a   :  { %v172_v56 = vpop.permute.xlu0 %171 }
  0xcc   :  { %v485_v9 = vpop.f32.mrf.mxu0 }
  0xcd   :  { %v122_v10 = vand.u32 2147483647, %v485_v9  ;;  %v116_v31 = vmax.f32 %v485_v9, 0.0  ;;  %vm118_vm4 = vcmp.ne.f32.partialorder %v485_v9, %v485_v9 }
  0xce   :  { %v488_v11 = vpop.f32.mrf.mxu0 }
  0xcf   :  { %v124_v12 = vsub.f32 0.0, %v122_v10  ;;  %v121_v13 = vand.u32 2147483647, %v488_v11  ;;  %v115_v36 = vmax.f32 %v488_v11, 0.0  ;;  %vm117_vm5 = vcmp.ne.f32.partialorder %v488_v11, %v488_v11 }
  0xd0   :  { %v200_v10 = vsub.s32 0, %v199_v7 }
  0xd1   :  { %v127_v14 = vmul.f32 1.442695, %v124_v12  ;;  %v123_v15 = vsub.f32 0.0, %v121_v13  ;;  %v220_v12 = vsub.s32 1, %v199_v7  ;;  %v187_v13 = vld [vmem:[%s578_s3] sm:$0x7] }
  0xd3   :  { %377 = vpow2.f32 %v127_v14  ;;  %v125_v16 = vmul.f32 1.442695, %v123_v15  ;;  %v206_v15 = vsub.s32 2, %v199_v7 }
  0xd5   :  { %379 = vpow2.f32 %v125_v16  ;;  %v201_v16 = vrot.slane %v187_v13, %v200_v10 }
  0xe0   :  { %v378_v17 = vpop.eup %377 }
  0xe1   :  { %v138_v18 = vadd.f32 1.0, %v378_v17  ;;  %v141_v21 = vmul.f32 -0.5, %v378_v17  ;;  %v144_v24 = vand.u32 2147483647, %v378_v17 }
  0xe2   :  { %v380_v19 = vpop.eup %379 }
  0xe3   :  { %381 = vlog2.f32 %v138_v18  ;;  %v129_v20 = vadd.f32 1.0, %v380_v19  ;;  %v132_v22 = vmul.f32 -0.5, %v380_v19  ;;  %v142_v23 = vadd.f32 1.0, %v141_v21 }
  0xe4   :  { %v135_v27 = vand.u32 2147483647, %v380_v19  ;;  %vm145_vm2 = vcmp.lt.f32.partialorder %v144_v24, 0.0004427343 }
  0xe5   :  { %383 = vlog2.f32 %v129_v20  ;;  %v133_v25 = vadd.f32 1.0, %v132_v22  ;;  %v143_v29 = vmul.f32 %v378_v17, %v142_v23  ;;  %v221_v17 = vrot.slane %v187_v13, %v220_v12 }
  0xe6   :  { %vm136_vm3 = vcmp.lt.f32.partialorder %v135_v27, 0.0004427343  ;;  %v250_v22 = vmul.f32 %v463_v4, %v463_v4  ;;  %v251_v27 = vmul.f32 %v472_v6, %v472_v6 }
  0xe7   :  { %v134_v34 = vmul.f32 %v380_v19, %v133_v25  ;;  %v207_v19 = vrot.slane %v187_v13, %v206_v15 }
  0xf0   :  { %v382_v26 = vpop.eup %381 }
  0xf1   :  { %v140_v28 = vmul.f32 0.6931472, %v382_v26 }
  0xf2   :  { %v384_v30 = vpop.eup %383 }
  0xf3   :  { %v146_v32 = vsel %vm145_vm2, %v143_v29, %v140_v28  ;;  %v131_v33 = vmul.f32 0.6931472, %v384_v30 }
  0xf4   :  { %v148_v35 = vadd.f32 %v146_v32, %v116_v31 }
  0xf5   :  { %v137_v37 = vsel %vm136_vm3, %v134_v34, %v131_v33 }
  0xf6   :  { %v496_v38 = vsel %vm118_vm4, %v485_v9, %v148_v35  ;;  %v147_v39 = vadd.f32 %v137_v37, %v115_v36 }
  0xf7   :  { %385 = vrsqrt.f32 %v496_v38  ;;  %vm160_vm6 = vcmp.eq.f32.partialorder %v496_v38, inf  ;;  %v163_v49 = vand.u32 2147483648, %v496_v38  ;;  %vm162_vm9 = vcmp.eq.f32.partialorder %v496_v38, 0.0 }
  0xf8   :  { %v502_v40 = vsel %vm117_vm5, %v488_v11, %v147_v39 }
  0xf9   :  { %387 = vrsqrt.f32 %v502_v40  ;;  %vm153_vm7 = vcmp.eq.f32.partialorder %v502_v40, inf  ;;  %v156_v48 = vand.u32 2147483648, %v502_v40  ;;  %vm155_vm8 = vcmp.eq.f32.partialorder %v502_v40, 0.0 }
 0x104   :  { %v386_v42 = vpop.eup %385 }
 0x105   :  { %v159_v43 = vmul.f32 %v386_v42, %v496_v38 }
 0x106   :  { %v388_v44 = vpop.eup %387 }
 0x107   :  { %v152_v45 = vmul.f32 %v388_v44, %v502_v40  ;;  %v161_v46 = vsel %vm160_vm6, %v496_v38, %v159_v43 }
 0x108   :  { %v164_v52 = vsel %vm162_vm9, %v163_v49, %v161_v46 }
 0x109   :  { %v154_v50 = vsel %vm153_vm7, %v502_v40, %v152_v45  ;;  %v166_v55 = vadd.f32 1e-05, %v164_v52 }
 0x10a   :  { %v157_v51 = vsel %vm155_vm8, %v156_v48, %v154_v50 }
 0x10b   :  { %v165_v53 = vadd.f32 1e-05, %v157_v51  ;;  %v176_v57 = vmul.f32 %v172_v56, %v166_v55 }
 0x10d   :  { %v175_v54 = vmul.f32 %v170_v47, %v165_v53  ;;  %389 = vlog2.f32 %v165_v53 }
 0x10e   :  { %391 = vlog2.f32 %v166_v55 }
 0x10f   :  { %179 = vrot.lane.b32.xlu1 %v175_v54, %s409_s0 }
 0x113   :  { %181 = vrot.lane.b32.xlu1 %v176_v57, %s409_s0 }
 0x11a   :  { %v390_v63 = vpop.eup %389 }
 0x11b   :  { %v257_v0 = vmul.f32 0.6931472, %v390_v63  ;;  %v392_v1 = vpop.eup %391 }
 0x11c   :  { %v259_v3 = vmul.f32 0.6931472, %v392_v1 }
 0x181   :  { %v180_v58 = vpop.permute.xlu1 %179 }
 0x182   :  { %v516_v59 = vadd.f32 %v180_v58, %v488_v11 }
 0x184   :  { %190 = vperm.xlu0 %374, %v516_v59   ;;  %v248_v25 = vmul.f32 %v516_v59, %v516_v59 }
 0x185   :  { %v182_v60 = vpop.permute.xlu1 %181 }
 0x186   :  { %v520_v61 = vadd.f32 %v485_v9, %v182_v60  ;;  %v252_v33 = vsub.f32 %v248_v25, %v250_v22 }
 0x188   :  { %376 = vset.pattern.permute.xlu0 %v410_v62  ;;  %195 = vperm.xlu1 %373, %v520_v61   ;;  %v249_v28 = vmul.f32 %v520_v61, %v520_v61  ;;  %v254_v39 = vmul.f32 0.5, %v252_v33 }
 0x189   :  { %215 = vperm.xlu0 %376, %v520_v61  }
 0x18a   :  { %v253_v35 = vsub.f32 %v249_v28, %v251_v27 }
 0x18c   :  { %375 = vset.pattern.permute.xlu1 %v410_v62  ;;  %v255_v43 = vmul.f32 0.5, %v253_v35 }
 0x18d   :  { %211 = vperm.xlu1 %375, %v516_v59  }
 0x191   :  { %262 = vrot.lane.b32.xlu1 %v257_v0, %s409_s0 }
 0x195   :  { %264 = vrot.lane.b32.xlu1 %v259_v3, %s409_s0 }
 0x1ff   :  { %v191_v14 = vpop.permute.xlu0 %190 }
 0x200   :  { %v202_v23 = vmul.f32 %v201_v16, %v191_v14 }
 0x202   :  { %v208_v31 = vadd.f32 %v207_v19, %v202_v23 }
 0x203   :  { %v196_v18 = vpop.permute.xlu1 %195 }
 0x204   :  { %v203_v20 = vmul.f32 %v201_v16, %v196_v18  ;;  %v216_v21 = vpop.permute.xlu0 %215 }
 0x205   :  { %v223_v24 = vmul.f32 %v221_v17, %v216_v21 }
 0x206   :  { %v209_v26 = vadd.f32 %v207_v19, %v203_v20 }
 0x208   :  { %v225_v29 = vadd.f32 %v223_v24, %v209_v26  ;;  %v212_v30 = vpop.permute.xlu1 %211 }
 0x209   :  { %v222_v32 = vmul.f32 %v221_v17, %v212_v30 }
 0x20a   :  { %v227_v4 = vsub.f32 %v481_v8, %v225_v29  ;;  %284 = vst.msk [vmem:[%s579_s4 + $0x8] sm:$0xff] %vm234_vm10, %v225_v29 }
 0x20b   :  { %v224_v34 = vadd.f32 %v222_v32, %v208_v31 }
 0x20c   :  { %v229_v36 = vmul.f32 49.975014, %v227_v4  ;;  %v263_v6 = vpop.permute.xlu1 %262 }
 0x20d   :  { %v226_v37 = vsub.f32 %v453_v2, %v224_v34  ;;  %283 = vst.msk [vmem:[%s579_s4] sm:$0xff] %vm234_vm10, %v224_v34  ;;  %v268_v8 = vsub.f32 %v254_v39, %v263_v6 }
 0x20e   :  { %v231_v41 = vmul.f32 -0.5, %v229_v36 }
 0x20f   :  { %v228_v42 = vmul.f32 49.975014, %v226_v37  ;;  %v271_v48 = vsel %vm270_vm11, %v268_v8, 0.0 }
 0x210   :  { %v265_v44 = vpop.permute.xlu1 %264  ;;  %v233_v47 = vmul.f32 %v231_v41, %v229_v36 }
 0x211   :  { %v269_v45 = vsub.f32 %v255_v43, %v265_v44  ;;  %v230_v46 = vmul.f32 -0.5, %v228_v42 }
 0x212   :  { %v236_v52 = vsel %vm234_vm10, %v233_v47, 0.0 }
 0x213   :  { %v272_v49 = vsel %vm270_vm11, %v269_v45, 0.0  ;;  %v232_v50 = vmul.f32 %v230_v46, %v228_v42 }
 0x214   :  { %v273_v51 = vadd.f32 %v272_v49, %v271_v48 }
 0x215   :  { %v235_v2 = vsel %vm234_vm10, %v232_v50, 0.0 }
 0x216   :  { %274 = vadd.xlane.f32.xlu1 %v273_v51  ;;  %v237_v53 = vadd.f32 %v236_v52, %v235_v2 }
 0x218   :  { %238 = vadd.xlane.f32.xlu0 %v237_v53 }
 0x227   :  { %287 = vrot.lane.b32.xlu1 %v520_v61, %s411_s15 }
 0x22b   :  { %298 = vrot.lane.b32.xlu1 %v485_v9, %s412_s16 }
 0x22e   :  { %285 = vrot.lane.b32.xlu0 %v516_v59, %s411_s15 }
 0x22f   :  { %309 = vrot.lane.b32.xlu1 %v496_v38, %s412_s16 }
 0x232   :  { %296 = vrot.lane.b32.xlu0 %v488_v11, %s412_s16 }
 0x236   :  { %307 = vrot.lane.b32.xlu0 %v502_v40, %s412_s16 }
 0x29f   :  { %v275_v54 = vpop.xlane.xlu1 %274 }
 0x2a0   :  { %v276_v55 = vrot.slane %v275_v54, 4 }
 0x2a1   :  { %v239_v56 = vpop.xlane.xlu0 %238 }
 0x2a2   :  { %v277_v57 = vadd.f32 %v276_v55, %v275_v54  ;;  %v240_v58 = vrot.slane %v239_v56, 4 }
 0x2a3   :  { %v288_v60 = vpop.permute.xlu1 %287 }
 0x2a4   :  { %v278_v62 = vrot.slane %v277_v57, 2  ;;  %v241_v61 = vadd.f32 %v240_v58, %v239_v56  ;;  %293 = vst.msk [vmem:[%s579_s4 + $0x8] sm:$0xff] %vm291_vm12, %v288_v60 }
 0x2a5   :  { %v286_v9 = vpop.permute.xlu0 %285 }
 0x2a6   :  { %v242_v38 = vrot.slane %v241_v61, 2  ;;  %292 = vst.msk [vmem:[%s579_s4] sm:$0xff] %vm291_vm12, %v286_v9  ;;  %v279_v11 = vadd.f32 %v278_v62, %v277_v57 }
 0x2a7   :  { %v299_v40 = vpop.permute.xlu1 %298 }
 0x2a8   :  { %304 = vst.msk [vmem:[%s579_s4 + $0x8] sm:$0xff] %vm302_vm13, %v299_v40  ;;  %v243_v59 = vadd.f32 %v242_v38, %v241_v61  ;;  %v280_v0 = vrot.slane %v279_v11, 1 }
 0x2a9   :  { %v297_v63 = vpop.permute.xlu0 %296 }
 0x2aa   :  { %303 = vst.msk [vmem:[%s579_s4] sm:$0xff] %vm302_vm13, %v297_v63  ;;  %v244_v1 = vrot.slane %v243_v59, 1  ;;  %v281_v10 = vadd.f32 %v280_v0, %v279_v11 }
 0x2ab   :  { %v310_v3 = vpop.permute.xlu1 %309 }
 0x2ac   :  { %315 = vst.msk [vmem:[%s579_s4 + $0x8] sm:$0xff] %vm313_vm14, %v310_v3  ;;  %v245_v5 = vadd.f32 %v244_v1, %v243_v59 }
 0x2ad   :  { %v308_v7 = vpop.permute.xlu0 %307 }
 0x2ae   :  { %314 = vst.msk [vmem:[%s579_s4] sm:$0xff] %vm313_vm14, %v308_v7 }
 0x2af   :  { %362 = vpush %v245_v5 }
 0x2b0   :  { %364 = vpush %v281_v10 }
 0x2e0   :  { %s363_s7 = spop %362 }
 0x2e1   :  { %s247_s8 = sadd.f32 1532.2034, %s363_s7  ;;  %s365_s9 = spop %364 }
 0x2e2   :  { %319 = sst [smem:[#allocation2 + $0x1]] %s365_s9 }
 0x2e3   :  { %317 = sst [smem:[#allocation2]] %s247_s8 }
 0x2e4   :  { %404 = shalt.err (!%p401_p4)
}
 0x2e5   :  { %s413_s4 = smov [#allocation2]  }
 0x2e6   :  { %331 = dma.smem_to_vmem %s413_s4, 16, %s329_s6, [#allocation3]  }
 0x2e7   :  { %405 = dma.done.wait [#allocation3], 16  }
 0x2e8   :  { %406 = vsyncadd [#allocation3], 4294967280 }
 0x2e9   :  { %337 = sfence }
 0x2ea   :  { %338 = vsyncpa [#allocation3], 1 }

</bundles_post_ra>
